<compile_context>
chip_gen: v7x
topology: tpu7x:2x2x1
jax: 0.10.0
libtpu: 0.0.40
codegen_flags: <defaults>
</compile_context>

<pallas_src>
import functools

import numpy as np
import jax
import jax.numpy as jnp
from jax.experimental import pallas as pl
from jax.experimental.pallas import tpu as pltpu


def _round_up(x, m):
    return ((x + m - 1) // m) * m


def _unary_block_kernel(x_ref, w_ref, scale_ref, shift_ref, out_ref, acc_ref,
                        *, negative_slope, apply_relu):
    """Fused (x @ W^T) * scale + shift (+ LeakyReLU).

    Grid: (N_tiles, Cout_tiles, Cin_tiles); Cin (k) is the reduction axis (last).

    x_ref:     (tn, tk)          input rows tile
    w_ref:     (tk, tc)          W^T tile ([Cin, Cout] layout)
    scale_ref: (1, tc)  f32      per-output-channel scale (BN folded / ones)
    shift_ref: (1, tc)  f32      per-output-channel shift (BN folded / bias)
    out_ref:   (tn, tc)
    acc_ref:   (tn, tc) f32      VMEM accumulator scratch
    """
    k = pl.program_id(2)

    @pl.when(k == 0)
    def _():
        acc_ref[...] = jnp.zeros_like(acc_ref)

    # Native-dtype operands, f32 accumulation on the MXU.
    acc_ref[...] += jnp.dot(x_ref[...], w_ref[...],
                            preferred_element_type=jnp.float32)

    @pl.when(k == pl.num_programs(2) - 1)
    def _():
        z = acc_ref[...] * scale_ref[...] + shift_ref[...]
        if apply_relu:
            z = jnp.where(z >= 0, z, z * negative_slope)
        out_ref[...] = z.astype(out_ref.dtype)


def unary_block_forward(x, weight, *, use_bn,
                        bias=None,
                        bn_gamma=None, bn_beta=None, bn_mean=None, bn_var=None,
                        bn_eps=1e-5,
                        no_relu=False, l_relu=0.1):
    """Pallas equivalent of UnaryBlock.forward (inference).

    Args:
      x:      [N, in_dim] point features.
      weight: [out_dim, in_dim] Linear weight (bias=False).
      use_bn: if True, fold eval-mode BatchNorm1d (gamma/beta/running stats)
              into a per-channel affine; else use the bias-only path.
    Returns:
      [N, out_dim] array.
    """
    N, cin = x.shape
    cout = weight.shape[0]

    if use_bn:
        inv_std = 1.0 / jnp.sqrt(bn_var.astype(jnp.float32) + jnp.float32(bn_eps))
        scale = bn_gamma.astype(jnp.float32) * inv_std
        shift = bn_beta.astype(jnp.float32) - bn_mean.astype(jnp.float32) * scale
    else:
        scale = jnp.ones((cout,), jnp.float32)
        shift = (jnp.zeros((cout,), jnp.float32) if bias is None
                 else bias.astype(jnp.float32))

    # ---- pad to TPU-friendly tile multiples (lane-dense, (8,128) layout) ----
    cin_p = _round_up(cin, 128)
    cout_p = _round_up(cout, 128)
    tn = min(256, _round_up(N, 8))      # row tile (sublane axis)
    tk = min(512, cin_p)                # reduction tile
    tc = min(256, cout_p)               # output-channel tile (lane axis)
    n_p = _round_up(N, tn)

    x_p = jnp.zeros((n_p, cin_p), x.dtype).at[:N, :cin].set(x)
    wt_p = jnp.zeros((cin_p, cout_p), weight.dtype).at[:cin, :cout].set(weight.T)
    scale_p = jnp.zeros((1, cout_p), jnp.float32).at[0, :cout].set(scale)
    shift_p = jnp.zeros((1, cout_p), jnp.float32).at[0, :cout].set(shift)

    grid = (n_p // tn, cout_p // tc, cin_p // tk)

    kernel = functools.partial(_unary_block_kernel,
                               negative_slope=float(l_relu),
                               apply_relu=not no_relu)

    out_p = pl.pallas_call(
        kernel,
        out_shape=jax.ShapeDtypeStruct((n_p, cout_p), x.dtype),
        grid_spec=pltpu.PrefetchScalarGridSpec(
            num_scalar_prefetch=0,
            grid=grid,
            in_specs=[
                pl.BlockSpec((tn, tk), lambda i, j, k: (i, k)),   # x rows tile
                pl.BlockSpec((tk, tc), lambda i, j, k: (k, j)),   # W^T tile
                pl.BlockSpec((1, tc), lambda i, j, k: (0, j)),    # scale
                pl.BlockSpec((1, tc), lambda i, j, k: (0, j)),    # shift
            ],
            out_specs=pl.BlockSpec((tn, tc), lambda i, j, k: (i, j)),
            scratch_shapes=[pltpu.VMEM((tn, tc), jnp.float32)],
        ),
        compiler_params=pltpu.CompilerParams(
            dimension_semantics=("parallel", "parallel", "arbitrary")),
    )(x_p, wt_p, scale_p, shift_p)

    return out_p[:N, :cout]


def _reference(x, weight, scale, shift, no_relu, l_relu):
    """Pure-numpy reference matching UnaryBlock.forward (inference)."""
    x = np.asarray(x, np.float32)
    w = np.asarray(weight, np.float32)
    z = x @ w.T
    z = z * np.asarray(scale, np.float32) + np.asarray(shift, np.float32)
    if not no_relu:
        z = np.where(z >= 0, z, z * l_relu)
    return z


if __name__ == "__main__":
    key = jax.random.PRNGKey(0)
    k1, k2, k3, k4, k5, k6, k7 = jax.random.split(key, 7)

    # Small shapes consistent with the module: N points, in_dim -> out_dim.
    N, in_dim, out_dim = 64, 32, 64
    l_relu = 0.1
    eps = 1e-5

    x = jax.random.normal(k1, (N, in_dim), dtype=jnp.float32)
    weight = jax.random.normal(k2, (out_dim, in_dim), dtype=jnp.float32)
    weight = weight * (1.0 / np.sqrt(in_dim))

    # --- case 1: use_bn=True (eval-mode BN folded) + LeakyReLU ---
    gamma = 1.0 + 0.1 * jax.random.normal(k3, (out_dim,), dtype=jnp.float32)
    beta = 0.1 * jax.random.normal(k4, (out_dim,), dtype=jnp.float32)
    r_mean = 0.1 * jax.random.normal(k5, (out_dim,), dtype=jnp.float32)
    r_var = jax.nn.softplus(jax.random.normal(k6, (out_dim,), dtype=jnp.float32)) + 0.5

    out_bn = unary_block_forward(
        x, weight, use_bn=True,
        bn_gamma=gamma, bn_beta=beta, bn_mean=r_mean, bn_var=r_var, bn_eps=eps,
        no_relu=False, l_relu=l_relu)
    out_bn = jax.block_until_ready(out_bn)

    scale_ref = np.asarray(gamma) / np.sqrt(np.asarray(r_var) + eps)
    shift_ref = np.asarray(beta) - np.asarray(r_mean) * scale_ref
    ref_bn = _reference(x, weight, scale_ref, shift_ref, no_relu=False, l_relu=l_relu)
    np.testing.assert_allclose(np.asarray(out_bn), ref_bn, rtol=1e-3, atol=1e-3)

    # --- case 2: use_bn=False (bias only), no_relu=True ---
    bias = 0.1 * jax.random.normal(k7, (out_dim,), dtype=jnp.float32)
    out_bias = unary_block_forward(
        x, weight, use_bn=False, bias=bias, no_relu=True, l_relu=l_relu)
    out_bias = jax.block_until_ready(out_bias)

    ref_bias = _reference(x, weight, np.ones(out_dim, np.float32),
                          np.asarray(bias), no_relu=True, l_relu=l_relu)
    np.testing.assert_allclose(np.asarray(out_bias), ref_bias, rtol=1e-3, atol=1e-3)

    print("KERNEL_OK")
</pallas_src>

<mosaic_0001>
module attributes {stable_mosaic.version = 11 : i64} {
  func.func @_unary_block_kernel(%arg0: i32, %arg1: i32, %arg2: i32, %arg3: memref<64x128xf32, #tpu.memory_space<vmem>>, %arg4: memref<128x128xf32, #tpu.memory_space<vmem>>, %arg5: memref<1x128xf32, #tpu.memory_space<vmem>>, %arg6: memref<1x128xf32, #tpu.memory_space<vmem>>, %arg7: memref<64x128xf32, #tpu.memory_space<vmem>>, %arg8: memref<64x128xf32, #tpu.memory_space<vmem>>) attributes {dimension_semantics = [#tpu.dimension_semantics<parallel>, #tpu.dimension_semantics<parallel>, #tpu.dimension_semantics<arbitrary>], iteration_bounds = array<i64: 1, 1, 1>, scalar_prefetch = 0 : i64, scratch_operands = 1 : i64, tpu.core_type = #tpu.core_type<tc>, window_params = [{transform_indices = @transform_0, window_bounds = array<i64: 64, 128>}, {transform_indices = @transform_1, window_bounds = array<i64: 128, 128>}, {transform_indices = @transform_2, window_bounds = array<i64: 1, 128>}, {transform_indices = @transform_3, window_bounds = array<i64: 1, 128>}, {transform_indices = @transform_4, window_bounds = array<i64: 64, 128>}]} {
    %c0_i32 = arith.constant 0 : i32
    %0 = arith.cmpi eq, %arg2, %c0_i32 : i32
    %1 = arith.extui %0 : i1 to i32
    %c0_i32_0 = arith.constant 0 : i32
    %2 = arith.cmpi ne, %1, %c0_i32_0 : i32
    scf.if %2 {
      %cst_10 = arith.constant 0.000000e+00 : f32
      %12 = vector.broadcast %cst_10 : f32 to vector<64x128xf32>
      %c0_11 = arith.constant 0 : index
      %c0_12 = arith.constant 0 : index
      %13 = vector.load %arg8[%c0_11, %c0_12] : memref<64x128xf32, #tpu.memory_space<vmem>>, vector<64x128xf32>
      tpu.vector_store %arg8[%c0_11, %c0_12], %12 {strides = array<i32>} : memref<64x128xf32, #tpu.memory_space<vmem>>, vector<64x128xf32>,
    } else {
    }
    %c0 = arith.constant 0 : index
    %c0_1 = arith.constant 0 : index
    %3 = vector.load %arg8[%c0, %c0_1] : memref<64x128xf32, #tpu.memory_space<vmem>>, vector<64x128xf32>
    %c0_2 = arith.constant 0 : index
    %c0_3 = arith.constant 0 : index
    %4 = vector.load %arg3[%c0_2, %c0_3] : memref<64x128xf32, #tpu.memory_space<vmem>>, vector<64x128xf32>
    %c0_4 = arith.constant 0 : index
    %c0_5 = arith.constant 0 : index
    %5 = vector.load %arg4[%c0_4, %c0_5] : memref<128x128xf32, #tpu.memory_space<vmem>>, vector<128x128xf32>
    %cst = arith.constant dense<0.000000e+00> : vector<64x128xf32>
    %6 = tpu.matmul %4, %5, %cst {dimension_numbers = #tpu.dot_dimension_numbers<[1], [0], [0], [1], [0, 0, 1, 1], [], []>} : vector<64x128xf32>, vector<128x128xf32>, vector<64x128xf32> -> vector<64x128xf32>
    %7 = arith.addf %3, %6 : vector<64x128xf32>
    %c0_6 = arith.constant 0 : index
    %c0_7 = arith.constant 0 : index
    %8 = vector.load %arg8[%c0_6, %c0_7] : memref<64x128xf32, #tpu.memory_space<vmem>>, vector<64x128xf32>
    tpu.vector_store %arg8[%c0_6, %c0_7], %7 {strides = array<i32>} : memref<64x128xf32, #tpu.memory_space<vmem>>, vector<64x128xf32>,
    %c0_i32_8 = arith.constant 0 : i32
    %9 = arith.cmpi eq, %arg2, %c0_i32_8 : i32
    %10 = arith.extui %9 : i1 to i32
    %c0_i32_9 = arith.constant 0 : i32
    %11 = arith.cmpi ne, %10, %c0_i32_9 : i32
    scf.if %11 {
      %c0_10 = arith.constant 0 : index
      %c0_11 = arith.constant 0 : index
      %12 = vector.load %arg8[%c0_10, %c0_11] : memref<64x128xf32, #tpu.memory_space<vmem>>, vector<64x128xf32>
      %c0_12 = arith.constant 0 : index
      %c0_13 = arith.constant 0 : index
      %13 = vector.load %arg5[%c0_12, %c0_13] : memref<1x128xf32, #tpu.memory_space<vmem>>, vector<1x128xf32>
      %14 = vector.broadcast %13 : vector<1x128xf32> to vector<64x128xf32>
      %15 = arith.mulf %12, %14 : vector<64x128xf32>
      %c0_14 = arith.constant 0 : index
      %c0_15 = arith.constant 0 : index
      %16 = vector.load %arg6[%c0_14, %c0_15] : memref<1x128xf32, #tpu.memory_space<vmem>>, vector<1x128xf32>
      %17 = vector.broadcast %16 : vector<1x128xf32> to vector<64x128xf32>
      %18 = arith.addf %15, %17 : vector<64x128xf32>
      %cst_16 = arith.constant 0.000000e+00 : f32
      %19 = vector.broadcast %cst_16 : f32 to vector<64x128xf32>
      %20 = arith.cmpf oge, %18, %19 : vector<64x128xf32>
      %cst_17 = arith.constant 1.000000e-01 : f32
      %21 = vector.broadcast %cst_17 : f32 to vector<64x128xf32>
      %22 = arith.mulf %18, %21 : vector<64x128xf32>
      %23 = arith.select %20, %18, %22 : vector<64x128xi1>, vector<64x128xf32>
      %c0_18 = arith.constant 0 : index
      %c0_19 = arith.constant 0 : index
      %24 = vector.load %arg7[%c0_18, %c0_19] : memref<64x128xf32, #tpu.memory_space<vmem>>, vector<64x128xf32>
      tpu.vector_store %arg7[%c0_18, %c0_19], %23 {strides = array<i32>} : memref<64x128xf32, #tpu.memory_space<vmem>>, vector<64x128xf32>,
    } else {
    }
    return
  }
  func.func @transform_0(%arg0: i32, %arg1: i32, %arg2: i32) -> (i32, i32) {
    %c0_i32 = arith.constant 0 : i32
    return %arg0, %arg2 : i32, i32
  }
  func.func @transform_1(%arg0: i32, %arg1: i32, %arg2: i32) -> (i32, i32) {
    %c0_i32 = arith.constant 0 : i32
    return %arg2, %arg1 : i32, i32
  }
  func.func @transform_2(%arg0: i32, %arg1: i32, %arg2: i32) -> (i32, i32) {
    %c0_i32 = arith.constant 0 : i32
    %c0_i32_0 = arith.constant 0 : i32
    return %c0_i32, %arg1 : i32, i32
  }
  func.func @transform_3(%arg0: i32, %arg1: i32, %arg2: i32) -> (i32, i32) {
    %c0_i32 = arith.constant 0 : i32
    %c0_i32_0 = arith.constant 0 : i32
    return %c0_i32, %arg1 : i32, i32
  }
  func.func @transform_4(%arg0: i32, %arg1: i32, %arg2: i32) -> (i32, i32) {
    %c0_i32 = arith.constant 0 : i32
    return %arg0, %arg1 : i32, i32
  }
}

</mosaic_0001>

<bundles_post_ra>
// kernel: tpu_custom_call.1
= control target key start
LH: loop header
LB: loop body
LE: loop exit
PB: predicated region body
PF: predicated region fallthrough
CT: control target
= control target key end

     0   :  { %9 = vsyncpa [#allocation4], 0  ;;  %s578_s0 = inlined_call_operand.hbm [shape: f32[64,128], index: 0, kind: input, shape index: {}]   ;;  %s579_s1 = inlined_call_operand.hbm [shape: f32[128,128], index: 1, kind: input, shape index: {}]   ;;  %s580_s2 = inlined_call_operand.vmem [shape: f32[1,128], index: 2, kind: input, shape index: {}]   ;;  %s581_s3 = inlined_call_operand.vmem [shape: f32[1,128], index: 3, kind: input, shape index: {}]   ;;  %s582_s4 = inlined_call_operand.hbm [shape: f32[64,128], index: 4, kind: output, shape index: {}]  }
   0x1   :  { %10 = vsyncpa [#allocation7], 0 }
   0x2   :  { %11 = vsyncpa [#allocation5], 0  ;;  %s497_s15 = smov [#allocation3]   ;;  %s425_s19 = scalar_lea.hbm %s578_s0, 1024 }
   0x3   :  { %s17_s16 = sshll.u32 %s497_s15, 4  ;;  %p426_p0 = scmp.ne.s32.totalorder %s578_s0, %s425_s19  ;;  %s18_s16 = int_to_ptr.vmem [resolvable:$true] %s17_s16 }
   0x4   :  { %p429_p1 = scmp.lt.u32.totalorder %s425_s19, %s578_s0 }
   0x6   :  { %p431_p2 = pnand %p429_p1, %p426_p0 }
   0x8   :  { %434 = shalt.err (!%p431_p2)
}
   0x9   :  { %s435_s24 = scalar_lea.vmem %s18_s16, 1024  ;;  %p440_p4 = scmp.lt.s32.totalorder %s18_s16, %s18_s16 }
   0xa   :  { %p436_p3 = scmp.ne.s32.totalorder %s18_s16, %s435_s24  ;;  %p441_p5 = scmp.lt.s32.totalorder %s435_s24, %s435_s24 }
   0xc   :  { %p442_p6 = por %p441_p5, %p440_p4 }
   0xe   :  { %p443_p7 = pnand %p442_p6, %p436_p3 }
  0x10   :  { %446 = shalt.err (!%p443_p7)
}
  0x11   :  { %s498_s25 = smov 128   ;;  %s499_s26 = smov 8  }
  0x12   :  { %23 = dma.hbm_to_vmem [thread:$0]  %s578_s0, 1024, %s18_s16, [#allocation4], %s498_s25, %s498_s25, %s499_s26  }
  0x13   :  { %s500_s29 = smov [#allocation6]   ;;  %s447_s7 = scalar_lea.hbm %s579_s1, 2048 }
  0x14   :  { %s29_s30 = sshll.u32 %s500_s29, 4  ;;  %p448_p8 = scmp.ne.s32.totalorder %s579_s1, %s447_s7  ;;  %s30_s30 = int_to_ptr.vmem [resolvable:$true] %s29_s30 }
  0x15   :  { %p451_p9 = scmp.lt.u32.totalorder %s447_s7, %s579_s1 }
  0x17   :  { %p453_p10 = pnand %p451_p9, %p448_p8 }
  0x19   :  { %456 = shalt.err (!%p453_p10)
}
  0x1a   :  { %s457_s12 = scalar_lea.vmem %s30_s30, 2048  ;;  %p462_p12 = scmp.lt.s32.totalorder %s30_s30, %s30_s30 }
  0x1b   :  { %p458_p11 = scmp.ne.s32.totalorder %s30_s30, %s457_s12  ;;  %p463_p13 = scmp.lt.s32.totalorder %s457_s12, %s457_s12 }
  0x1d   :  { %p464_p0 = por %p463_p13, %p462_p12 }
  0x1f   :  { %p465_p1 = pnand %p464_p0, %p458_p11 }
  0x21   :  { %468 = shalt.err (!%p465_p1)
}
  0x22   :  { %35 = dma.hbm_to_vmem [thread:$0]  %s579_s1, 2048, %s30_s30, [#allocation7], %s498_s25, %s498_s25, %s499_s26  }
  0x23   :  { %491 = dma.done.wait [#allocation4], 1024  }
  0x24   :  { %492 = vsyncadd [#allocation4], 4294966272 }
  0x25   :  { %493 = dma.done.wait [#allocation7], 2048  }
  0x26   :  { %494 = vsyncadd [#allocation7], 4294965248  ;;  %v74_v0 = vld [vmem:[#allocation6] sm:$0xff]  ;;  %v75_v1 = vld [vmem:[#allocation6 + $0x8] sm:$0xff] }
  0x27   :  { %v76_v2 = vld [vmem:[#allocation6 + $0x10] sm:$0xff]  ;;  %v372_v3 = vpack.c.bf16 %v75_v1, %v74_v0  ;;  %v77_v4 = vld [vmem:[#allocation6 + $0x18] sm:$0xff]  ;;  %v78_v6 = vld [vmem:[#allocation6 + $0x20] sm:$0xff] }
  0x28   :  { %v376_v5 = vpack.c.bf16 %v77_v4, %v76_v2  ;;  %v79_v7 = vld [vmem:[#allocation6 + $0x28] sm:$0xff]  ;;  %v66_v9 = vld [vmem:[#allocation3] sm:$0xff]  ;;  %v80_v11 = vld [vmem:[#allocation6 + $0x30] sm:$0xff] }
  0x29   :  { %373 = vmatprep.subr.bf16.mxu0 %v372_v3  ;;  %404 = vmatprep.subr.bf16.mxu1 %v372_v3  ;;  %v380_v8 = vpack.c.bf16 %v79_v7, %v78_v6  ;;  %v70_v10 = vld [vmem:[#allocation3 + $0x20] sm:$0xff]  ;;  %v81_v12 = vld [vmem:[#allocation6 + $0x38] sm:$0xff]  ;;  %v83_v15 = vld [vmem:[#allocation6 + $0x48] sm:$0xff] }
  0x2a   :  { %375 = vmatpush3.bf16.msra.mxu0 %v372_v3  ;;  %412 = vmatpush3.bf16.msra.mxu1 %v372_v3  ;;  %v384_v13 = vpack.c.bf16 %v81_v12, %v80_v11  ;;  %v82_v14 = vld [vmem:[#allocation6 + $0x40] sm:$0xff]  ;;  %v84_v17 = vld [vmem:[#allocation6 + $0x50] sm:$0xff]  ;;  %v85_v18 = vld [vmem:[#allocation6 + $0x58] sm:$0xff] }
  0x2b   :  { %377 = vmatprep.subr.bf16.mxu0 %v376_v5  ;;  %405 = vmatprep.subr.bf16.mxu1 %v376_v5  ;;  %v388_v16 = vpack.c.bf16 %v83_v15, %v82_v14  ;;  %v392_v19 = vpack.c.bf16 %v85_v18, %v84_v17  ;;  %v86_v20 = vld [vmem:[#allocation6 + $0x60] sm:$0xff]  ;;  %v87_v21 = vld [vmem:[#allocation6 + $0x68] sm:$0xff]  ;;  %v88_v23 = vld [vmem:[#allocation6 + $0x70] sm:$0xff] }
  0x2c   :  { %360 = vmatprep.mubr.f32.mxu0 %v66_v9  ;;  %366 = vmatprep.mubr.f32.mxu1 %v70_v10  ;;  %v396_v22 = vpack.c.bf16 %v87_v21, %v86_v20  ;;  %v89_v24 = vld [vmem:[#allocation6 + $0x78] sm:$0xff]  ;;  %v67_v26 = vld [vmem:[#allocation3 + $0x8] sm:$0xff]  ;;  %v68_v28 = vld [vmem:[#allocation3 + $0x10] sm:$0xff] }
  0x2d   :  { %v400_v25 = vpack.c.bf16 %v89_v24, %v88_v23  ;;  %v71_v27 = vld [vmem:[#allocation3 + $0x28] sm:$0xff]  ;;  %v72_v29 = vld [vmem:[#allocation3 + $0x30] sm:$0xff]  ;;  %v69_v30 = vld [vmem:[#allocation3 + $0x18] sm:$0xff] }
  0x2e   :  { %379 = vmatpush3.bf16.msra.mxu0 %v376_v5  ;;  %413 = vmatpush3.bf16.msra.mxu1 %v376_v5  ;;  %v73_v31 = vld [vmem:[#allocation3 + $0x38] sm:$0xff]  ;;  %v302_v32 = vld [vmem:[%s580_s2] ss:$0 sm:$0xff]  ;;  %s501_s2 = smov [#allocation8]  }
  0x2f   :  { %381 = vmatprep.subr.bf16.mxu0 %v380_v8  ;;  %406 = vmatprep.subr.bf16.mxu1 %v380_v8  ;;  %v303_v34 = vld [vmem:[%s581_s3] ss:$0 sm:$0xff]  ;;  %s289_s3 = sshll.u32 %s501_s2, 4  ;;  %s290_s3 = int_to_ptr.vmem [resolvable:$true] %s289_s3 }
  0x30   :  { %s469_s17 = scalar_lea.vmem %s290_s3, 1024  ;;  %p474_p3 = scmp.lt.s32.totalorder %s290_s3, %s290_s3 }
  0x31   :  { %p470_p2 = scmp.ne.s32.totalorder %s290_s3, %s469_s17  ;;  %p475_p4 = scmp.lt.s32.totalorder %s469_s17, %s469_s17 }
  0x32   :  { %383 = vmatpush3.bf16.msra.mxu0 %v380_v8  ;;  %414 = vmatpush3.bf16.msra.mxu1 %v380_v8 }
  0x33   :  { %385 = vmatprep.subr.bf16.mxu0 %v384_v13  ;;  %407 = vmatprep.subr.bf16.mxu1 %v384_v13  ;;  %p476_p5 = por %p475_p4, %p474_p3 }
  0x35   :  { %p477_p6 = pnand %p476_p5, %p470_p2 }
  0x36   :  { %387 = vmatpush3.bf16.msra.mxu0 %v384_v13  ;;  %415 = vmatpush3.bf16.msra.mxu1 %v384_v13 }
  0x37   :  { %389 = vmatprep.subr.bf16.mxu0 %v388_v16  ;;  %408 = vmatprep.subr.bf16.mxu1 %v388_v16 }
  0x3a   :  { %391 = vmatpush3.bf16.msra.mxu0 %v388_v16  ;;  %416 = vmatpush3.bf16.msra.mxu1 %v388_v16 }
  0x3b   :  { %393 = vmatprep.subr.bf16.mxu0 %v392_v19  ;;  %409 = vmatprep.subr.bf16.mxu1 %v392_v19 }
  0x3e   :  { %395 = vmatpush3.bf16.msra.mxu0 %v392_v19  ;;  %417 = vmatpush3.bf16.msra.mxu1 %v392_v19 }
  0x3f   :  { %397 = vmatprep.subr.bf16.mxu0 %v396_v22  ;;  %410 = vmatprep.subr.bf16.mxu1 %v396_v22 }
  0x42   :  { %399 = vmatpush3.bf16.msra.mxu0 %v396_v22  ;;  %418 = vmatpush3.bf16.msra.mxu1 %v396_v22 }
  0x43   :  { %401 = vmatprep.subr.bf16.mxu0 %v400_v25  ;;  %411 = vmatprep.subr.bf16.mxu1 %v400_v25 }
  0x46   :  { %403 = vmatpush3.bf16.msra.mxu0 %v400_v25  ;;  %419 = vmatpush3.bf16.msra.mxu1 %v400_v25 }
  0x49   :  { %361 = vmatmul.mubr.f32.vlgmr.msra.gmra.mrb[0].mxu0 %v67_v26  ;;  %367 = vmatmul.mubr.f32.vlgmr.msra.gmra.mrb[0].mxu1 %v71_v27 }
  0x4a   :  { %363 = vmatprep.mubr.f32.mxu0 %v68_v28  ;;  %369 = vmatprep.mubr.f32.mxu1 %v72_v29 }
  0x4d   :  { %364 = vmatmul.mubr.f32.gmra.mrb[2].mxu0 %v69_v30  ;;  %370 = vmatmul.mubr.f32.gmra.mrb[2].mxu1 %v73_v31 }
 0x11c   :  { %v362_v33 = vpop.f32.mrb[0].mxu0  ;;  %v368_v35 = vpop.f32.mrb[0].mxu1 }
 0x11d   :  { %v230_v36 = vmul.f32 %v362_v33, %v302_v32  ;;  %v234_v37 = vmul.f32 %v368_v35, %v302_v32  ;;  %v156_v38 = vpop.f32.mrb[1].mxu0  ;;  %v176_v39 = vpop.f32.mrb[1].mxu1 }
 0x11e   :  { %v229_v40 = vmul.f32 %v302_v32, %v156_v38  ;;  %v233_v41 = vmul.f32 %v302_v32, %v176_v39 }
 0x11f   :  { %v245_v42 = vadd.f32 %v303_v34, %v230_v36  ;;  %v249_v43 = vadd.f32 %v303_v34, %v234_v37 }
 0x120   :  { %v244_v44 = vadd.f32 %v303_v34, %v229_v40  ;;  %v248_v45 = vadd.f32 %v303_v34, %v233_v41  ;;  %v365_v46 = vpop.f32.mrb[2].mxu0  ;;  %v371_v47 = vpop.f32.mrb[2].mxu1 }
 0x121   :  { %vm253_vm0 = vcmp.ge.f32.partialorder %v245_v42, 0.0  ;;  %v261_v48 = vmul.f32 0.1, %v245_v42  ;;  %vm257_vm1 = vcmp.ge.f32.partialorder %v249_v43, 0.0  ;;  %v265_v49 = vmul.f32 0.1, %v249_v43 }
 0x122   :  { %vm252_vm2 = vcmp.ge.f32.partialorder %v244_v44, 0.0  ;;  %v260_v50 = vmul.f32 0.1, %v244_v44  ;;  %vm256_vm3 = vcmp.ge.f32.partialorder %v248_v45, 0.0  ;;  %v264_v51 = vmul.f32 0.1, %v248_v45 }
 0x123   :  { %v269_v52 = vsel %vm253_vm0, %v245_v42, %v261_v48  ;;  %v273_v53 = vsel %vm257_vm1, %v249_v43, %v265_v49  ;;  %v232_v54 = vmul.f32 %v365_v46, %v302_v32  ;;  %v236_v55 = vmul.f32 %v371_v47, %v302_v32  ;;  %v166_v56 = vpop.f32.mrb[3].mxu0  ;;  %v186_v57 = vpop.f32.mrb[3].mxu1 }
 0x124   :  { %277 = vst [vmem:[#allocation8 + $0x8] sm:$0xff] %v269_v52  ;;  %281 = vst [vmem:[#allocation8 + $0x28] sm:$0xff] %v273_v53  ;;  %v268_v58 = vsel %vm252_vm2, %v244_v44, %v260_v50  ;;  %v272_v59 = vsel %vm256_vm3, %v248_v45, %v264_v51  ;;  %v231_v60 = vmul.f32 %v302_v32, %v166_v56 }
 0x125   :  { %v235_v61 = vmul.f32 %v302_v32, %v186_v57  ;;  %276 = vst [vmem:[#allocation8] sm:$0xff] %v268_v58  ;;  %280 = vst [vmem:[#allocation8 + $0x20] sm:$0xff] %v272_v59  ;;  %v247_v62 = vadd.f32 %v303_v34, %v232_v54  ;;  %v251_v63 = vadd.f32 %v303_v34, %v236_v55 }
 0x126   :  { %v246_v0 = vadd.f32 %v303_v34, %v231_v60 }
 0x127   :  { %v250_v1 = vadd.f32 %v303_v34, %v235_v61  ;;  %vm255_vm4 = vcmp.ge.f32.partialorder %v247_v62, 0.0  ;;  %v263_v2 = vmul.f32 0.1, %v247_v62  ;;  %vm259_vm5 = vcmp.ge.f32.partialorder %v251_v63, 0.0 }
 0x128   :  { %v267_v3 = vmul.f32 0.1, %v251_v63  ;;  %vm254_vm6 = vcmp.ge.f32.partialorder %v246_v0, 0.0  ;;  %v262_v4 = vmul.f32 0.1, %v246_v0 }
 0x129   :  { %vm258_vm7 = vcmp.ge.f32.partialorder %v250_v1, 0.0  ;;  %v266_v5 = vmul.f32 0.1, %v250_v1  ;;  %v271_v6 = vsel %vm255_vm4, %v247_v62, %v263_v2 }
 0x12a   :  { %v275_v7 = vsel %vm259_vm5, %v251_v63, %v267_v3  ;;  %279 = vst [vmem:[#allocation8 + $0x18] sm:$0xff] %v271_v6  ;;  %v270_v8 = vsel %vm254_vm6, %v246_v0, %v262_v4 }
 0x12b   :  { %283 = vst [vmem:[#allocation8 + $0x38] sm:$0xff] %v275_v7  ;;  %v274_v9 = vsel %vm258_vm7, %v250_v1, %v266_v5  ;;  %278 = vst [vmem:[#allocation8 + $0x10] sm:$0xff] %v270_v8 }
 0x12c   :  { %282 = vst [vmem:[#allocation8 + $0x30] sm:$0xff] %v274_v9 }
 0x12d   :  { %480 = shalt.err (!%p477_p6)
}
 0x12e   :  { %s481_s20 = scalar_lea.hbm %s582_s4, 1024 }
 0x12f   :  { %p482_p7 = scmp.ne.s32.totalorder %s582_s4, %s481_s20  ;;  %p485_p8 = scmp.lt.u32.totalorder %s481_s20, %s582_s4 }
 0x131   :  { %p487_p9 = pnand %p485_p8, %p482_p7 }
 0x133   :  { %490 = shalt.err (!%p487_p9)
}
 0x134   :  { %295 = dma.vmem_to_hbm [thread:$0]  %s290_s3, 1024, %s582_s4, [#allocation5], %s498_s25, %s498_s25, %s499_s26  }
 0x135   :  { %495 = dma.done.wait [#allocation5], 1024  }
 0x136   :  { %496 = vsyncadd [#allocation5], 4294966272 }
 0x137   :  { %299 = vsyncpa [#allocation4], 1 }
 0x138   :  { %300 = vsyncpa [#allocation7], 1 }
 0x139   :  { %301 = vsyncpa [#allocation5], 1 }

</bundles_post_ra>
